<compile_context>
chip_gen: v5e
topology: v5e:2x2
jax: 0.10.0
libtpu: 0.0.40
codegen_flags: <defaults>
</compile_context>

<pallas_src>
import functools

import jax
import jax.numpy as jnp
from jax.experimental import pallas as pl
from jax.experimental.pallas import tpu as pltpu


def _wmse_kernel(x_ref, t_ref, w_ref, o_ref, acc_ref, *,
                 n_rows, tm, blocks_per_core, needs_mask):
    c = pl.program_id(0)          # core (parallel) axis
    i = pl.program_id(1)          # reduction (arbitrary) axis
    f = x_ref.shape[1]

    @pl.when(i == 0)
    def _():
        acc_ref[...] = jnp.zeros_like(acc_ref)

    # Unweighted squared error -- the weight multiply is hoisted to the end.
    d = x_ref[...].astype(jnp.float32) - t_ref[...].astype(jnp.float32)
    err = d * d                                                   # (tm, F)

    if needs_mask:
        # Logical global block index (may point past the last real block on
        # dummy steps of the padded per-core grid; the index_map clamps the
        # DMA, this mask zeroes the contribution).
        g = c * blocks_per_core + i
        row = jax.lax.broadcasted_iota(jnp.int32, (tm, 1), 0)
        err = jnp.where(row < (n_rows - g * tm), err, 0.0)

    # Vreg-shaped partial accumulation: fold rows into the (acc_rows, F)
    # accumulator with elementwise adds only (no XLU on the inner loop).
    acc_rows = acc_ref.shape[0]
    if acc_rows > 1 and tm % acc_rows == 0:
        partial = err.reshape(tm // acc_rows, acc_rows, f).sum(axis=0)
    else:
        partial = jnp.sum(err, axis=0, keepdims=True)
    acc_ref[...] += partial

    # Weight multiply + single cross-lane reduce, once per core at the end.
    @pl.when(i == pl.num_programs(1) - 1)
    def _():
        psum = jnp.sum(acc_ref[...] * w_ref[...])
        o_ref[...] = jnp.full(o_ref.shape, psum, o_ref.dtype)


def weighted_mse_loss(x, t, w, *, tm=None):
    """mean((x - t)**2 * w) with w (F,) broadcast over rows, via Pallas TPU."""
    B, F = x.shape
    assert t.shape == (B, F), (t.shape, (B, F))
    assert w.shape == (F,), (w.shape, (F,))

    # ---- tile sizing (dtype- and VMEM-aware) -------------------------------
    itemsize = jnp.dtype(x.dtype).itemsize
    data_budget = 32 * 1024 * 1024                  # streaming bufs + f32 temps
    bytes_per_row = F * (2 * 2 * itemsize + 3 * 4)  # 2 in x 2 bufs + ~3 f32 tmps
    tm_budget = max(8, (data_budget // bytes_per_row) // 8 * 8)
    if tm is None:
        tm_eff = tm_budget
    else:
        tm_eff = max(8, (min(int(tm), tm_budget) // 8) * 8)
    if tm_eff >= B:
        tm_eff = B  # single full-batch block (full-extent dim is always legal)

    total_blocks = pl.cdiv(B, tm_eff)
    # Shard the reduction over v7x's 2 TensorCores with a leading "parallel"
    # axis; on 1-TC chips (v5e/v6e) this is just a cheap outer loop.
    num_cores = 2 if total_blocks >= 2 else 1
    bpc = pl.cdiv(total_blocks, num_cores)          # row blocks per core
    needs_mask = (B % tm_eff != 0) or (num_cores * bpc != total_blocks)

    acc_rows = 8 if tm_eff % 8 == 0 else 1
    n_total = float(B) * float(F)

    def in_map(c, i):
        # Clamp dummy trailing blocks of the padded per-core grid in-bounds.
        return (jnp.minimum(c * bpc + i, total_blocks - 1), 0)

    kernel = functools.partial(
        _wmse_kernel, n_rows=B, tm=tm_eff, blocks_per_core=bpc,
        needs_mask=needs_mask)

    out = pl.pallas_call(
        kernel,
        out_shape=jax.ShapeDtypeStruct((num_cores, 8, 128), jnp.float32),
        grid_spec=pltpu.PrefetchScalarGridSpec(
            num_scalar_prefetch=0,
            grid=(num_cores, bpc),
            in_specs=[
                pl.BlockSpec((tm_eff, F), in_map),          # input tile
                pl.BlockSpec((tm_eff, F), in_map),          # target tile
                pl.BlockSpec((1, F), lambda c, i: (0, 0)),  # weights (resident)
            ],
            out_specs=pl.BlockSpec((1, 8, 128), lambda c, i: (c, 0, 0)),
            scratch_shapes=[pltpu.VMEM((acc_rows, F), jnp.float32)],
        ),
        compiler_params=pltpu.CompilerParams(
            dimension_semantics=("parallel", "arbitrary"),
            vmem_limit_bytes=48 * 1024 * 1024,
        ),
    )(x, t, w.reshape(1, F))

    # Sum the per-core partial weighted sums, then normalize.
    return out[:, 0, 0].sum() / n_total


if __name__ == "__main__":
    B, F = 16, 128  # small, deterministic test shapes

    key = jax.random.PRNGKey(0)
    kx, kt = jax.random.split(key)
    x = jax.random.normal(kx, (B, F), dtype=jnp.float32)
    t = jax.random.normal(kt, (B, F), dtype=jnp.float32)
    # deterministic "weights" argument of the module's __init__ (shape (F,))
    w = jnp.linspace(0.5, 1.5, F, dtype=jnp.float32)

    loss = weighted_mse_loss(x, t, w)
    jax.block_until_ready(loss)
    ref = jnp.mean((x - t) ** 2 * w)
    assert jnp.allclose(loss, ref, rtol=1e-5, atol=1e-6), (loss, ref)

    # Ragged batch (B % 8 != 0): full-extent single block, acc_rows == 1 path.
    B2 = 13
    x2 = jax.random.normal(kx, (B2, F), dtype=jnp.float32)
    t2 = jax.random.normal(kt, (B2, F), dtype=jnp.float32)
    loss2 = weighted_mse_loss(x2, t2, w)
    jax.block_until_ready(loss2)
    ref2 = jnp.mean((x2 - t2) ** 2 * w)
    assert jnp.allclose(loss2, ref2, rtol=1e-5, atol=1e-6), (loss2, ref2)

    # Multi-block + two-core split + tail mask + clamped dummy block path.
    B3 = 40
    x3 = jax.random.normal(kx, (B3, F), dtype=jnp.float32)
    t3 = jax.random.normal(kt, (B3, F), dtype=jnp.float32)
    loss3 = weighted_mse_loss(x3, t3, w, tm=16)
    jax.block_until_ready(loss3)
    ref3 = jnp.mean((x3 - t3) ** 2 * w)
    assert jnp.allclose(loss3, ref3, rtol=1e-5, atol=1e-6), (loss3, ref3)

    print("KERNEL_OK")
</pallas_src>

<mosaic_0001>
module attributes {stable_mosaic.version = 11 : i64} {
  func.func @_wmse_kernel(%arg0: i32, %arg1: i32, %arg2: memref<16x128xf32, #tpu.memory_space<vmem>>, %arg3: memref<16x128xf32, #tpu.memory_space<vmem>>, %arg4: memref<1x128xf32, #tpu.memory_space<vmem>>, %arg5: memref<1x8x128xf32, #tpu.memory_space<vmem>>, %arg6: memref<8x128xf32, #tpu.memory_space<vmem>>) attributes {dimension_semantics = [#tpu.dimension_semantics<parallel>, #tpu.dimension_semantics<arbitrary>], iteration_bounds = array<i64: 1, 1>, scalar_prefetch = 0 : i64, scratch_operands = 1 : i64, tpu.core_type = #tpu.core_type<tc>, window_params = [{transform_indices = @transform_0, window_bounds = array<i64: 16, 128>}, {transform_indices = @transform_1, window_bounds = array<i64: 16, 128>}, {pipeline_mode = #tpu.pipeline_mode<synchronous>, transform_indices = @transform_2, window_bounds = array<i64: 1, 128>}, {transform_indices = @transform_3, window_bounds = array<i64: 1, 8, 128>}]} {
    %c0_i32 = arith.constant 0 : i32
    %0 = arith.cmpi eq, %arg1, %c0_i32 : i32
    %1 = arith.extui %0 : i1 to i32
    %c0_i32_0 = arith.constant 0 : i32
    %2 = arith.cmpi ne, %1, %c0_i32_0 : i32
    scf.if %2 {
      %cst_10 = arith.constant 0.000000e+00 : f32
      %15 = vector.broadcast %cst_10 : f32 to vector<8x128xf32>
      %c0_11 = arith.constant 0 : index
      %c0_12 = arith.constant 0 : index
      %16 = vector.load %arg6[%c0_11, %c0_12] : memref<8x128xf32, #tpu.memory_space<vmem>>, vector<8x128xf32>
      tpu.vector_store %arg6[%c0_11, %c0_12], %15 {strides = array<i32>} : memref<8x128xf32, #tpu.memory_space<vmem>>, vector<8x128xf32>,
    } else {
    }
    %c0 = arith.constant 0 : index
    %c0_1 = arith.constant 0 : index
    %3 = vector.load %arg2[%c0, %c0_1] : memref<16x128xf32, #tpu.memory_space<vmem>>, vector<16x128xf32>
    %c0_2 = arith.constant 0 : index
    %c0_3 = arith.constant 0 : index
    %4 = vector.load %arg3[%c0_2, %c0_3] : memref<16x128xf32, #tpu.memory_space<vmem>>, vector<16x128xf32>
    %5 = arith.subf %3, %4 : vector<16x128xf32>
    %6 = arith.mulf %5, %5 : vector<16x128xf32>
    %7 = vector.shape_cast %6 : vector<16x128xf32> to vector<2x8x128xf32>
    %cst = arith.constant dense<0.000000e+00> : vector<8x128xf32>
    %8 = vector.multi_reduction <add>, %7, %cst [0] : vector<2x8x128xf32> to vector<8x128xf32>
    %c0_4 = arith.constant 0 : index
    %c0_5 = arith.constant 0 : index
    %9 = vector.load %arg6[%c0_4, %c0_5] : memref<8x128xf32, #tpu.memory_space<vmem>>, vector<8x128xf32>
    %10 = arith.addf %9, %8 : vector<8x128xf32>
    %c0_6 = arith.constant 0 : index
    %c0_7 = arith.constant 0 : index
    %11 = vector.load %arg6[%c0_6, %c0_7] : memref<8x128xf32, #tpu.memory_space<vmem>>, vector<8x128xf32>
    tpu.vector_store %arg6[%c0_6, %c0_7], %10 {strides = array<i32>} : memref<8x128xf32, #tpu.memory_space<vmem>>, vector<8x128xf32>,
    %c0_i32_8 = arith.constant 0 : i32
    %12 = arith.cmpi eq, %arg1, %c0_i32_8 : i32
    %13 = arith.extui %12 : i1 to i32
    %c0_i32_9 = arith.constant 0 : i32
    %14 = arith.cmpi ne, %13, %c0_i32_9 : i32
    scf.if %14 {
      %c0_10 = arith.constant 0 : index
      %c0_11 = arith.constant 0 : index
      %15 = vector.load %arg6[%c0_10, %c0_11] : memref<8x128xf32, #tpu.memory_space<vmem>>, vector<8x128xf32>
      %c0_12 = arith.constant 0 : index
      %c0_13 = arith.constant 0 : index
      %16 = vector.load %arg4[%c0_12, %c0_13] : memref<1x128xf32, #tpu.memory_space<vmem>>, vector<1x128xf32>
      %17 = vector.broadcast %16 : vector<1x128xf32> to vector<8x128xf32>
      %18 = arith.mulf %15, %17 : vector<8x128xf32>
      %19 = vector.shape_cast %18 : vector<8x128xf32> to vector<1x8x128xf32>
      %cst_14 = arith.constant dense<0.000000e+00> : vector<1xf32>
      %20 = vector.multi_reduction <add>, %19, %cst_14 [1, 2] : vector<1x8x128xf32> to vector<1xf32>
      %21 = vector.shape_cast %20 : vector<1xf32> to vector<1x1x1xf32>
      %22 = vector.extract %21[0, 0, 0] : f32 from vector<1x1x1xf32>
      %23 = vector.broadcast %22 : f32 to vector<1x8x128xf32>
      %c0_15 = arith.constant 0 : index
      %c0_16 = arith.constant 0 : index
      %c0_17 = arith.constant 0 : index
      %24 = vector.load %arg5[%c0_15, %c0_16, %c0_17] : memref<1x8x128xf32, #tpu.memory_space<vmem>>, vector<1x8x128xf32>
      tpu.vector_store %arg5[%c0_15, %c0_16, %c0_17], %23 {strides = array<i32>} : memref<1x8x128xf32, #tpu.memory_space<vmem>>, vector<1x8x128xf32>,
    } else {
    }
    return
  }
  func.func @transform_0(%arg0: i32, %arg1: i32) -> (i32, i32) {
    %c1_i32 = arith.constant 1 : i32
    %0 = arith.muli %arg0, %c1_i32 : i32
    %1 = arith.addi %0, %arg1 : i32
    %c0_i32 = arith.constant 0 : i32
    %2 = arith.minsi %1, %c0_i32 : i32
    %c0_i32_0 = arith.constant 0 : i32
    %c0_i32_1 = arith.constant 0 : i32
    return %2, %c0_i32_0 : i32, i32
  }
  func.func @transform_1(%arg0: i32, %arg1: i32) -> (i32, i32) {
    %c1_i32 = arith.constant 1 : i32
    %0 = arith.muli %arg0, %c1_i32 : i32
    %1 = arith.addi %0, %arg1 : i32
    %c0_i32 = arith.constant 0 : i32
    %2 = arith.minsi %1, %c0_i32 : i32
    %c0_i32_0 = arith.constant 0 : i32
    %c0_i32_1 = arith.constant 0 : i32
    return %2, %c0_i32_0 : i32, i32
  }
  func.func @transform_2(%arg0: i32, %arg1: i32) -> (i32, i32) {
    %c0_i32 = arith.constant 0 : i32
    %c0_i32_0 = arith.constant 0 : i32
    %c0_i32_1 = arith.constant 0 : i32
    return %c0_i32, %c0_i32_0 : i32, i32
  }
  func.func @transform_3(%arg0: i32, %arg1: i32) -> (i32, i32, i32) {
    %c0_i32 = arith.constant 0 : i32
    %c0_i32_0 = arith.constant 0 : i32
    %c0_i32_1 = arith.constant 0 : i32
    return %arg0, %c0_i32, %c0_i32_0 : i32, i32, i32
  }
}

</mosaic_0001>

<bundles_post_ra>
// kernel: tpu_custom_call.1
= control target key start
LH: loop header
LB: loop body
LE: loop exit
PB: predicated region body
PF: predicated region fallthrough
CT: control target
= control target key end

     0   :  { %8 = vsyncpa [#allocation4], 0  ;;  %s249_s0 = inlined_call_operand.hbm [shape: f32[16,128], index: 0, kind: input, shape index: {}]   ;;  %s250_s1 = inlined_call_operand.hbm [shape: f32[16,128], index: 1, kind: input, shape index: {}]   ;;  %s251_s2 = inlined_call_operand.vmem [shape: f32[1,128], index: 2, kind: input, shape index: {}]   ;;  %s252_s3 = inlined_call_operand.hbm [shape: f32[1,8,128], index: 3, kind: output, shape index: {}]  }
   0x1   :  { %9 = vsyncpa [#allocation7], 0 }
   0x2   :  { %10 = vsyncpa [#allocation5], 0  ;;  %s21_s14 = sshll.u32 %s249_s0, 4  ;;  %s212_s15 = smov [#allocation3]   ;;  %s22_s14 = int_to_ptr.hbm [resolvable:$true] %s21_s14 }
   0x3   :  { %s23_s16 = sshll.u32 %s212_s15, 4  ;;  %s40_s19 = sshll.u32 %s250_s1, 4  ;;  %s24_s16 = int_to_ptr.vmem [resolvable:$true] %s23_s16  ;;  %s41_s19 = int_to_ptr.hbm [resolvable:$true] %s40_s19 }
   0x4   :  { %s213_s20 = smov 128   ;;  %s214_s21 = smov 8  }
   0x5   :  { %29 = dma.hbm_to_vmem [thread:$0]  %s22_s14, 256, %s24_s16, [#allocation4], %s213_s20, %s213_s20, %s214_s21  }
   0x6   :  { %s215_s22 = smov [#allocation6]  }
   0x7   :  { %s42_s23 = sshll.u32 %s215_s22, 4  ;;  %s43_s23 = int_to_ptr.vmem [resolvable:$true] %s42_s23 }
   0x8   :  { %48 = dma.hbm_to_vmem [thread:$0]  %s41_s19, 256, %s43_s23, [#allocation7], %s213_s20, %s213_s20, %s214_s21  }
   0x9   :  { %206 = dma.done.wait [#allocation4], 256  }
   0xa   :  { %207 = vsyncadd [#allocation4], 4294967040 }
   0xb   :  { %208 = dma.done.wait [#allocation7], 256  }
   0xc   :  { %209 = vsyncadd [#allocation7], 4294967040  ;;  %v72_v0 = vld [vmem:[#allocation3] sm:$0xff]  ;;  %v73_v1 = vld [vmem:[#allocation3 + $0x8] sm:$0xff]  ;;  %s216_s24 = smov [#allocation8]   ;;  %s111_s28 = sshll.u32 %s252_s3, 4  ;;  %s112_s28 = int_to_ptr.hbm [resolvable:$true] %s111_s28 }
   0xd   :  { %v74_v2 = vld [vmem:[#allocation6] sm:$0xff]  ;;  %v75_v3 = vld [vmem:[#allocation6 + $0x8] sm:$0xff]  ;;  %v133_v8 = vld [vmem:[%s251_s2] ss:$0 sm:$0xff]  ;;  %s109_s25 = sshll.u32 %s216_s24, 4  ;;  %s110_s25 = int_to_ptr.vmem [resolvable:$true] %s109_s25 }
   0xe   :  { %v76_v4 = vsub.f32 %v72_v0, %v74_v2  ;;  %v77_v5 = vsub.f32 %v73_v1, %v75_v3 }
  0x10   :  { %v78_v6 = vmul.f32 %v76_v4, %v76_v4  ;;  %v79_v7 = vmul.f32 %v77_v5, %v77_v5 }
  0x12   :  { %v80_v9 = vadd.f32 %v79_v7, %v78_v6 }
  0x14   :  { %v92_v10 = vmul.f32 %v133_v8, %v80_v9 }
  0x16   :  { %93 = vadd.xlane.f32.xlu0 %v92_v10 }
  0x89   :  { %v94_v11 = vpop.xlane.xlu0 %93 }
  0x8a   :  { %v95_v12 = vrot.slane %v94_v11, 4 }
  0x8c   :  { %v96_v13 = vadd.f32 %v95_v12, %v94_v11 }
  0x8e   :  { %v97_v14 = vrot.slane %v96_v13, 2 }
  0x90   :  { %v98_v15 = vadd.f32 %v97_v14, %v96_v13 }
  0x92   :  { %v99_v16 = vrot.slane %v98_v15, 1 }
  0x94   :  { %v100_v17 = vadd.f32 %v99_v16, %v98_v15 }
  0x96   :  { %126 = vpush %v100_v17 }
  0xc7   :  { %s127_s29 = spop %126 }
  0xc8   :  { %v102_v18 = vstv %s127_s29 }
  0xc9   :  { %103 = vst [vmem:[#allocation8] sm:$0xff] %v102_v18 }
  0xca   :  { %114 = dma.vmem_to_hbm [thread:$0]  %s110_s25, 128, %s112_s28, [#allocation5]  }
  0xcb   :  { %210 = dma.done.wait [#allocation5], 128  }
  0xcc   :  { %211 = vsyncadd [#allocation5], 4294967168 }
  0xcd   :  { %119 = vsyncpa [#allocation4], 1 }
  0xce   :  { %120 = vsyncpa [#allocation7], 1 }
  0xcf   :  { %121 = vsyncpa [#allocation5], 1 }

</bundles_post_ra>
